<compile_context>
chip_gen: v7x
topology: tpu7x:2x2x1
jax: 0.10.0
libtpu: 0.0.40
codegen_flags: <defaults>
</compile_context>

<pallas_src>
import jax
import jax.numpy as jnp
import numpy as np
from jax import lax
from jax.experimental import pallas as pl
from jax.experimental.pallas import tpu as pltpu

_BLOCK_BUDGET = 2 * 1024 * 1024    # ~2 MiB per block (safe on v7x's 64 MiB VMEM)
_VMEM_LIMIT = 32 * 1024 * 1024     # explicit scoped-VMEM limit (v5e default is 16 MiB)


# ---------------------------------------------------------------------------
# Kernels
# ---------------------------------------------------------------------------
def _stats_kernel(x_ref, rm_ref, sums_ref):
    """Per-channel shifted sum and sum-of-squares.

    Grid = (C-chunks ['parallel'], batch tiles ['arbitrary'], HW tiles
    ['arbitrary']).  The (1, 2, tc) output block is resident across both
    reduction axes, so it doubles as the accumulator (no scratch).
    """
    first = (pl.program_id(1) == 0) & (pl.program_id(2) == 0)

    @pl.when(first)
    def _init():
        sums_ref[...] = jnp.zeros_like(sums_ref)

    x = x_ref[...].astype(jnp.float32)        # (tn, tc, thw)
    rm = rm_ref[...]                          # (1, tc, 1) fp32 shift (numerics)
    xc = x - rm
    # Reduce over batch first (pure VPU adds), then ONE lane reduce per channel.
    s_b = jnp.sum(xc, axis=0)                 # (tc, thw)
    q_b = jnp.sum(xc * xc, axis=0)            # (tc, thw)
    ps1 = jnp.sum(s_b, axis=-1).reshape(1, 1, -1)   # (1, 1, tc)
    ps2 = jnp.sum(q_b, axis=-1).reshape(1, 1, -1)   # (1, 1, tc)
    sums_ref[0:1, 0:1, :] += ps1
    sums_ref[0:1, 1:2, :] += ps2


def _make_affine_kernel(compute_dtype):
    def _affine_kernel(x_ref, ab_ref, z_ref):
        """z = x * A + B on the lane-dense (N, C*HW) view; A/B are pre-expanded rows."""
        x = x_ref[...].astype(compute_dtype)          # (tn, tf)
        a = ab_ref[0:1, :].astype(compute_dtype)      # (1, tf)
        b = ab_ref[1:2, :].astype(compute_dtype)      # (1, tf)
        z_ref[...] = (x * a + b).astype(z_ref.dtype)
    return _affine_kernel


# ---------------------------------------------------------------------------
# Tiling heuristics
# ---------------------------------------------------------------------------
def _pick_affine_tiles(n, f, itemsize, budget=_BLOCK_BUDGET):
    """(tn, tf) for the 2-D (N, F) affine pass.  cdiv grids -> tails are safe."""
    tn_unit = 8 if n >= 8 else n            # sublane rule: multiple of 8 or full N
    if f * tn_unit * itemsize <= budget:
        tf = f                              # full, lane-dense rows
        rows = budget // (f * itemsize)
        if n >= 8:
            tn = min(n, max(8, (rows // 8) * 8))
        else:
            tn = n
    else:
        tn = tn_unit
        tf = max(128, (budget // (tn * itemsize)) // 128 * 128)   # multiple of 128
        tf = min(tf, f)
    return tn, tf


def _pick_stats_tiles(n, c, hw, itemsize, budget=_BLOCK_BUDGET):
    """(tn, tc, thw, nc) for the (N, C, HW) stats pass.  Divisor tiles only, so
    the reduction never reads padded garbage."""
    # Channel chunks: a leading 'parallel' axis so v7x megacore can shard pass 1.
    big_enough = n * c * hw * itemsize >= (1 << 20)
    nc = 2 if (c % 16 == 0 and c >= 16 and big_enough) else 1
    tc = c // nc
    # HW tile: full unless a single (1, tc, hw) slab exceeds the budget; then the
    # largest divisor of hw that is a multiple of 128 and fits.
    thw = hw
    if tc * hw * itemsize > budget:
        cand = [d for d in range(128, hw + 1, 128)
                if hw % d == 0 and tc * d * itemsize <= budget]
        if cand:
            thw = cand[-1]
        # TODO(synk): masked non-divisor HW tiles for awkward hw factorizations.
    # Batch tile: largest divisor of n whose block fits the budget.
    tn = 1
    for d in range(1, n + 1):
        if n % d == 0 and d * tc * thw * itemsize <= budget:
            tn = d
    return tn, tc, thw, nc


# ---------------------------------------------------------------------------
# Pallas wrappers
# ---------------------------------------------------------------------------
def _channel_sums(x3, rm, tn, tc, thw, nc):
    n, c, hw = x3.shape
    rm3 = rm.reshape(1, c, 1).astype(jnp.float32)
    return pl.pallas_call(
        _stats_kernel,
        grid=(nc, n // tn, hw // thw),
        in_specs=[pl.BlockSpec((tn, tc, thw), lambda ci, ni, hi: (ni, ci, hi)),
                  pl.BlockSpec((1, tc, 1), lambda ci, ni, hi: (0, ci, 0))],
        out_specs=pl.BlockSpec((1, 2, tc), lambda ci, ni, hi: (ci, 0, 0)),
        out_shape=jax.ShapeDtypeStruct((nc, 2, tc), jnp.float32),
        compiler_params=pltpu.CompilerParams(
            dimension_semantics=("parallel", "arbitrary", "arbitrary"),
            vmem_limit_bytes=_VMEM_LIMIT),
    )(x3, rm3)


def _expand_ab(a, b, c, hw):
    """Pre-expand per-channel scale/shift to lane-dense (2, C*HW) rows (once, in JAX)."""
    a_row = jnp.broadcast_to(a.astype(jnp.float32)[:, None], (c, hw)).reshape(1, c * hw)
    b_row = jnp.broadcast_to(b.astype(jnp.float32)[:, None], (c, hw)).reshape(1, c * hw)
    return jnp.concatenate([a_row, b_row], axis=0)


def _apply_affine(x2, ab, tn, tf):
    n, f = x2.shape
    compute_dtype = jnp.bfloat16 if x2.dtype == jnp.bfloat16 else jnp.float32
    # NOTE: pipeline_mode=pl.Buffered(3) on the x spec is a possible ~few-% win if
    # profiling shows exposed DMA between steps; left at the default double buffer.
    return pl.pallas_call(
        _make_affine_kernel(compute_dtype),
        grid=(pl.cdiv(n, tn), pl.cdiv(f, tf)),
        in_specs=[pl.BlockSpec((tn, tf), lambda i, j: (i, j)),
                  pl.BlockSpec((2, tf), lambda i, j: (0, j))],
        out_specs=pl.BlockSpec((tn, tf), lambda i, j: (i, j)),
        out_shape=jax.ShapeDtypeStruct((n, f), x2.dtype),
        compiler_params=pltpu.CompilerParams(
            dimension_semantics=("parallel", "parallel"),
            vmem_limit_bytes=_VMEM_LIMIT),
    )(x2, ab)


def stoch_norm_2d(x, running_mean, running_var, weight, bias, *,
                  p=0.5, eps=1e-5, momentum=0.1, training=True, key=None):
    """StochNorm2d forward.  x is NCHW.  Returns (z, new_running_mean, new_running_var)."""
    n, c, h, w = x.shape
    hw = h * w
    f = c * hw
    m = n * hw
    itemsize = jnp.dtype(x.dtype).itemsize

    rm = running_mean.astype(jnp.float32)
    rv = running_var.astype(jnp.float32)
    wg = weight.astype(jnp.float32)
    bs = bias.astype(jnp.float32)

    # z0 affine: normalize with running statistics (F.batch_norm, training=False).
    a0 = wg * lax.rsqrt(rv + eps)
    b0 = bs - rm * a0

    x2 = x.reshape(n, f)                       # free reshape; lane-dense affine view
    tn_a, tf_a = _pick_affine_tiles(n, f, itemsize)

    if not training:
        z2 = _apply_affine(x2, _expand_ab(a0, b0, c, hw), tn_a, tf_a)
        return z2.reshape(n, c, h, w), running_mean, running_var

    assert key is not None, "training=True requires a PRNG key"

    # Pass 1: per-channel batch statistics (single pass, shifted by running_mean).
    x3 = x.reshape(n, c, hw)                   # free reshape; stats view
    tn_s, tc_s, thw_s, nc_s = _pick_stats_tiles(n, c, hw, itemsize)
    sums = _channel_sums(x3, rm, tn_s, tc_s, thw_s, nc_s)       # (nc, 2, tc)
    sums = jnp.transpose(sums, (1, 0, 2)).reshape(2, c)         # (2, C)

    mean_c = sums[0] / m                                        # E[x - rm]
    var = jnp.maximum(sums[1] / m - mean_c * mean_c, 0.0)       # E[(x-rm)^2] - E[x-rm]^2
    mu = mean_c + rm

    # z1 affine: normalize with batch statistics (F.batch_norm, training=True).
    a1 = wg * lax.rsqrt(var + eps)
    b1 = bs - mu * a1

    # Stochastic per-channel selection (distributionally matches np.random.binomial).
    s = jax.random.bernoulli(key, p, (c,)).astype(jnp.float32)
    a = (1.0 - s) * a0 + s * a1
    b = (1.0 - s) * b0 + s * b1

    # Pass 2: fused per-channel affine, lane-dense, fully parallel grid.
    z2 = _apply_affine(x2, _expand_ab(a, b, c, hw), tn_a, tf_a)

    # Running-stat update (PyTorch uses the unbiased variance here).
    unbiased = var * (m / (m - 1)) if m > 1 else var
    new_rm = (1.0 - momentum) * rm + momentum * mu
    new_rv = (1.0 - momentum) * rv + momentum * unbiased

    return z2.reshape(n, c, h, w), new_rm, new_rv


# ---------------------------------------------------------------------------
# Pure-JAX reference (same math, no Pallas) for a correctness sanity check.
# ---------------------------------------------------------------------------
def _reference(x, rm, rv, w, b, s, *, eps, momentum, training):
    C = x.shape[1]
    bshape = (1, C, 1, 1)
    z0 = ((x - rm.reshape(bshape)) / jnp.sqrt(rv.reshape(bshape) + eps)
          * w.reshape(bshape) + b.reshape(bshape))
    if not training:
        return z0, rm, rv
    mu = jnp.mean(x, axis=(0, 2, 3))
    var = jnp.mean((x - mu.reshape(bshape)) ** 2, axis=(0, 2, 3))
    z1 = ((x - mu.reshape(bshape)) / jnp.sqrt(var.reshape(bshape) + eps)
          * w.reshape(bshape) + b.reshape(bshape))
    sb = s.reshape(bshape)
    z = (1.0 - sb) * z0 + sb * z1
    m = x.shape[0] * x.shape[2] * x.shape[3]
    new_rm = (1.0 - momentum) * rm + momentum * mu
    new_rv = (1.0 - momentum) * rv + momentum * var * (m / (m - 1))
    return z, new_rm, new_rv


if __name__ == "__main__":
    key = jax.random.PRNGKey(0)
    k_x, k_w, k_s = jax.random.split(key, 3)

    N, C, H, W = 2, 4, 16, 16
    p, eps, momentum = 0.5, 1e-5, 0.1

    # Deterministic parameter init mirroring _StochNorm.reset_parameters():
    #   weight ~ U[0,1), bias = 0, running_mean = 0, running_var = 1.
    weight = jax.random.uniform(k_w, (C,), dtype=jnp.float32)
    bias = jnp.zeros((C,), jnp.float32)
    running_mean = jnp.zeros((C,), jnp.float32)
    running_var = jnp.ones((C,), jnp.float32)

    x = jax.random.normal(k_x, (N, C, H, W), dtype=jnp.float32)

    # Training-mode forward (stochastic per-channel mix of z_0 and z_1).
    z_train, new_rm, new_rv = stoch_norm_2d(
        x, running_mean, running_var, weight, bias,
        p=p, eps=eps, momentum=momentum, training=True, key=k_s)
    jax.block_until_ready(z_train)

    # Eval-mode forward (running-stats normalization only).
    z_eval, _, _ = stoch_norm_2d(
        x, running_mean, running_var, weight, bias,
        p=p, eps=eps, momentum=momentum, training=False)
    jax.block_until_ready(z_eval)

    # Sanity check against the pure-JAX reference (same Bernoulli mask).
    s_mask = jax.random.bernoulli(k_s, p, (C,)).astype(jnp.float32)
    ref_train, ref_rm, ref_rv = _reference(
        x, running_mean, running_var, weight, bias, s_mask,
        eps=eps, momentum=momentum, training=True)
    ref_eval, _, _ = _reference(
        x, running_mean, running_var, weight, bias, s_mask,
        eps=eps, momentum=momentum, training=False)

    np.testing.assert_allclose(np.asarray(z_train), np.asarray(ref_train),
                               rtol=1e-4, atol=1e-4)
    np.testing.assert_allclose(np.asarray(z_eval), np.asarray(ref_eval),
                               rtol=1e-4, atol=1e-4)
    np.testing.assert_allclose(np.asarray(new_rm), np.asarray(ref_rm),
                               rtol=1e-5, atol=1e-5)
    np.testing.assert_allclose(np.asarray(new_rv), np.asarray(ref_rv),
                               rtol=1e-5, atol=1e-5)

    print("KERNEL_OK")
</pallas_src>

<mosaic_0001>
module attributes {stable_mosaic.version = 11 : i64} {
  func.func @_stats_kernel(%arg0: i32, %arg1: i32, %arg2: i32, %arg3: memref<2x4x256xf32, #tpu.memory_space<vmem>>, %arg4: memref<1x4x1xf32, #tpu.memory_space<vmem>>, %arg5: memref<1x2x4xf32, #tpu.memory_space<vmem>>) attributes {dimension_semantics = [#tpu.dimension_semantics<parallel>, #tpu.dimension_semantics<arbitrary>, #tpu.dimension_semantics<arbitrary>], iteration_bounds = array<i64: 1, 1, 1>, scalar_prefetch = 0 : i64, scratch_operands = 0 : i64, tpu.core_type = #tpu.core_type<tc>, window_params = [{transform_indices = @transform_0, window_bounds = array<i64: 2, 4, 256>}, {transform_indices = @transform_1, window_bounds = array<i64: 1, 4, 1>}, {transform_indices = @transform_2, window_bounds = array<i64: 1, 2, 4>}]} {
    %c0_i32 = arith.constant 0 : i32
    %0 = arith.cmpi eq, %arg1, %c0_i32 : i32
    %c0_i32_0 = arith.constant 0 : i32
    %1 = arith.cmpi eq, %arg2, %c0_i32_0 : i32
    %2 = arith.andi %0, %1 : i1
    %3 = arith.extui %2 : i1 to i32
    %c0_i32_1 = arith.constant 0 : i32
    %4 = arith.cmpi ne, %3, %c0_i32_1 : i32
    scf.if %4 {
      %cst_21 = arith.constant 0.000000e+00 : f32
      %22 = vector.broadcast %cst_21 : f32 to vector<1x2x4xf32>
      %c0_22 = arith.constant 0 : index
      %c0_23 = arith.constant 0 : index
      %c0_24 = arith.constant 0 : index
      %23 = vector.load %arg5[%c0_22, %c0_23, %c0_24] : memref<1x2x4xf32, #tpu.memory_space<vmem>>, vector<1x2x4xf32>
      tpu.vector_store %arg5[%c0_22, %c0_23, %c0_24], %22 {strides = array<i32>} : memref<1x2x4xf32, #tpu.memory_space<vmem>>, vector<1x2x4xf32>,
    } else {
    }
    %c0 = arith.constant 0 : index
    %c0_2 = arith.constant 0 : index
    %c0_3 = arith.constant 0 : index
    %5 = vector.load %arg3[%c0, %c0_2, %c0_3] : memref<2x4x256xf32, #tpu.memory_space<vmem>>, vector<2x4x256xf32>
    %c0_4 = arith.constant 0 : index
    %c0_5 = arith.constant 0 : index
    %c0_6 = arith.constant 0 : index
    %6 = vector.load %arg4[%c0_4, %c0_5, %c0_6] : memref<1x4x1xf32, #tpu.memory_space<vmem>>, vector<1x4x1xf32>
    %7 = vector.broadcast %6 : vector<1x4x1xf32> to vector<2x4x256xf32>
    %8 = arith.subf %5, %7 : vector<2x4x256xf32>
    %cst = arith.constant dense<0.000000e+00> : vector<4x256xf32>
    %9 = vector.multi_reduction <add>, %8, %cst [0] : vector<2x4x256xf32> to vector<4x256xf32>
    %10 = arith.mulf %8, %8 : vector<2x4x256xf32>
    %cst_7 = arith.constant dense<0.000000e+00> : vector<4x256xf32>
    %11 = vector.multi_reduction <add>, %10, %cst_7 [0] : vector<2x4x256xf32> to vector<4x256xf32>
    %cst_8 = arith.constant dense<0.000000e+00> : vector<4xf32>
    %12 = vector.multi_reduction <add>, %9, %cst_8 [1] : vector<4x256xf32> to vector<4xf32>
    %13 = vector.shape_cast %12 : vector<4xf32> to vector<1x1x4xf32>
    %cst_9 = arith.constant dense<0.000000e+00> : vector<4xf32>
    %14 = vector.multi_reduction <add>, %11, %cst_9 [1] : vector<4x256xf32> to vector<4xf32>
    %15 = vector.shape_cast %14 : vector<4xf32> to vector<1x1x4xf32>
    %c0_10 = arith.constant 0 : index
    %c0_11 = arith.constant 0 : index
    %c0_12 = arith.constant 0 : index
    %16 = vector.load %arg5[%c0_10, %c0_11, %c0_12] : memref<1x2x4xf32, #tpu.memory_space<vmem>>, vector<1x1x4xf32>
    %17 = arith.addf %16, %13 : vector<1x1x4xf32>
    %c0_13 = arith.constant 0 : index
    %c0_14 = arith.constant 0 : index
    %c0_15 = arith.constant 0 : index
    %18 = vector.load %arg5[%c0_13, %c0_14, %c0_15] : memref<1x2x4xf32, #tpu.memory_space<vmem>>, vector<1x1x4xf32>
    tpu.vector_store %arg5[%c0_13, %c0_14, %c0_15], %17 {strides = array<i32>} : memref<1x2x4xf32, #tpu.memory_space<vmem>>, vector<1x1x4xf32>,
    %c0_16 = arith.constant 0 : index
    %c1 = arith.constant 1 : index
    %c0_17 = arith.constant 0 : index
    %19 = vector.load %arg5[%c0_16, %c1, %c0_17] : memref<1x2x4xf32, #tpu.memory_space<vmem>>, vector<1x1x4xf32>
    %20 = arith.addf %19, %15 : vector<1x1x4xf32>
    %c0_18 = arith.constant 0 : index
    %c1_19 = arith.constant 1 : index
    %c0_20 = arith.constant 0 : index
    %21 = vector.load %arg5[%c0_18, %c1_19, %c0_20] : memref<1x2x4xf32, #tpu.memory_space<vmem>>, vector<1x1x4xf32>
    tpu.vector_store %arg5[%c0_18, %c1_19, %c0_20], %20 {strides = array<i32>} : memref<1x2x4xf32, #tpu.memory_space<vmem>>, vector<1x1x4xf32>,
    return
  }
  func.func @transform_0(%arg0: i32, %arg1: i32, %arg2: i32) -> (i32, i32, i32) {
    %c0_i32 = arith.constant 0 : i32
    return %arg1, %arg0, %arg2 : i32, i32, i32
  }
  func.func @transform_1(%arg0: i32, %arg1: i32, %arg2: i32) -> (i32, i32, i32) {
    %c0_i32 = arith.constant 0 : i32
    %c0_i32_0 = arith.constant 0 : i32
    %c0_i32_1 = arith.constant 0 : i32
    return %c0_i32, %arg0, %c0_i32_0 : i32, i32, i32
  }
  func.func @transform_2(%arg0: i32, %arg1: i32, %arg2: i32) -> (i32, i32, i32) {
    %c0_i32 = arith.constant 0 : i32
    %c0_i32_0 = arith.constant 0 : i32
    %c0_i32_1 = arith.constant 0 : i32
    return %arg0, %c0_i32, %c0_i32_0 : i32, i32, i32
  }
}

</mosaic_0001>

<bundles_post_ra>
// kernel: tpu_custom_call.1
= control target key start
LH: loop header
LB: loop body
LE: loop exit
PB: predicated region body
PF: predicated region fallthrough
CT: control target
= control target key end

     0   :  { %7 = vsyncpa [#allocation3], 0  ;;  %s241_s0 = inlined_call_operand.hbm [shape: f32[2,4,256], index: 0, kind: input, shape index: {}]   ;;  %s242_s1 = inlined_call_operand.vmem [shape: f32[1,4,1], index: 1, kind: input, shape index: {}]   ;;  %s243_s2 = inlined_call_operand.hbm [shape: f32[1,2,4], index: 2, kind: output, shape index: {}]  }
   0x1   :  { %8 = vsyncpa [#allocation4], 0  ;;  %s180_s9 = smov [#allocation2]   ;;  %s132_s13 = scalar_lea.hbm %s241_s0, 256 }
   0x2   :  { %s14_s10 = sshll.u32 %s180_s9, 4  ;;  %p133_p0 = scmp.ne.s32.totalorder %s241_s0, %s132_s13  ;;  %s15_s10 = int_to_ptr.vmem [resolvable:$true] %s14_s10 }
   0x3   :  { %p136_p1 = scmp.lt.u32.totalorder %s132_s13, %s241_s0 }
   0x5   :  { %p138_p2 = pnand %p136_p1, %p133_p0 }
   0x7   :  { %141 = shalt.err (!%p138_p2)
}
   0x8   :  { %s142_s18 = scalar_lea.vmem %s15_s10, 256  ;;  %p147_p4 = scmp.lt.s32.totalorder %s15_s10, %s15_s10 }
   0x9   :  { %p143_p3 = scmp.ne.s32.totalorder %s15_s10, %s142_s18  ;;  %p148_p5 = scmp.lt.s32.totalorder %s142_s18, %s142_s18 }
   0xb   :  { %p149_p6 = por %p148_p5, %p147_p4 }
   0xd   :  { %p150_p7 = pnand %p149_p6, %p143_p3 }
   0xf   :  { %153 = shalt.err (!%p150_p7)
}
  0x10   :  { %s181_s19 = smov 128   ;;  %s182_s20 = smov 8  }
  0x11   :  { %20 = dma.hbm_to_vmem [thread:$0]  %s241_s0, 256, %s15_s10, [#allocation3], %s181_s19, %s181_s19, %s182_s20  }
  0x12   :  { %176 = dma.done.wait [#allocation3], 256  }
  0x13   :  { %177 = vsyncadd [#allocation3], 4294967040  ;;  %vm32_vm0 = vcmask 25600   ;;  %v183_v0 = vmov 0.0   ;;  %v184_v1 = vmov 0   ;;  %v44_v3 = vlaneseq  ;;  %v34_v12 = vld [vmem:[#allocation2] sm:$0xff] }
  0x14   :  { %33 = vst.msk [vmem:[#allocation5] sm:$0x3] %vm32_vm0, %v183_v0  ;;  %131 = vset.pattern.permute.xlu0 %v184_v1  ;;  %v36_v2 = vld [vmem:[%s242_s1] sm:$0xf]  ;;  %v185_v7 = vmov 839922192  }
  0x15   :  { %39 = vperm.xlu0 %131, %v36_v2   ;;  %v45_v4 = vshrl.u32 %v44_v3, 7  ;;  %v91_v5 = vand.u32 127, %v44_v3  ;;  %v42_v8 = vunpack.c.l.s4 %v185_v7  ;;  %v35_v13 = vld [vmem:[#allocation2 + $0x8] sm:$0xff]  ;;  %vm57_vm1 = vcmask 1043456   ;;  %s186_s0 = smov [#allocation5]  }
  0x16   :  { %vm98_vm2 = vcmask 24576   ;;  %s115_s1 = sshll.u32 %s186_s0, 4  ;;  %s116_s1 = int_to_ptr.vmem [resolvable:$true] %s115_s1 }
  0x17   :  { %v94_v6 = vsub.s32 %v91_v5, %v45_v4  ;;  %v43_v9 = vunpack.c.0.s8 %v42_v8  ;;  %s154_s25 = scalar_lea.vmem %s116_s1, 32  ;;  %p159_p9 = scmp.lt.s32.totalorder %s116_s1, %s116_s1 }
  0x18   :  { %p155_p8 = scmp.ne.s32.totalorder %s116_s1, %s154_s25  ;;  %p160_p10 = scmp.lt.s32.totalorder %s154_s25, %s154_s25 }
  0x19   :  { %v46_v10 = vsub.s32 %v43_v9, %v45_v4 }
  0x1a   :  { %p161_p11 = por %p160_p10, %p159_p9 }
  0x1b   :  { %v88_v42 = vld [vmem:[#allocation5] sm:$0x1]  ;;  %v100_v46 = vld [vmem:[#allocation5 + $0x1] sm:$0x1] }
  0x1c   :  { %p162_p12 = pnand %p161_p11, %p155_p8 }
  0x94   :  { %v40_v11 = vpop.permute.xlu0 %39 }
  0x95   :  { %v47_v14 = vrot.slane %v40_v11, %v46_v10 }
  0x97   :  { %v49_v15 = vsub.f32 %v34_v12, %v47_v14  ;;  %v50_v16 = vsub.f32 %v35_v13, %v47_v14 }
  0x99   :  { %v53_v17 = vcombine.high %v49_v15, %v49_v15  ;;  %v54_v18 = vcombine.high %v50_v16, %v50_v16  ;;  %v58_v19 = vsel %vm57_vm1, %v49_v15, 0.0  ;;  %v59_v20 = vsel %vm57_vm1, %v50_v16, 0.0 }
  0x9a   :  { %v60_v21 = vadd.f32 %v59_v20, %v58_v19  ;;  %v64_v22 = vmul.f32 %v49_v15, %v49_v15  ;;  %v65_v23 = vmul.f32 %v50_v16, %v50_v16 }
  0x9b   :  { %v61_v24 = vsel %vm57_vm1, %v53_v17, 0.0  ;;  %v62_v25 = vsel %vm57_vm1, %v54_v18, 0.0 }
  0x9c   :  { %v63_v26 = vadd.f32 %v62_v25, %v61_v24  ;;  %v68_v27 = vcombine.high %v64_v22, %v64_v22  ;;  %v69_v28 = vcombine.high %v65_v23, %v65_v23  ;;  %v78_v29 = vsel %vm57_vm1, %v60_v21, 0.0 }
  0x9d   :  { %v72_v30 = vsel %vm57_vm1, %v64_v22, 0.0  ;;  %v73_v31 = vsel %vm57_vm1, %v65_v23, 0.0 }
  0x9e   :  { %v79_v32 = vsel %vm57_vm1, %v63_v26, 0.0  ;;  %v74_v33 = vadd.f32 %v73_v31, %v72_v30  ;;  %v75_v34 = vsel %vm57_vm1, %v68_v27, 0.0  ;;  %v76_v35 = vsel %vm57_vm1, %v69_v28, 0.0 }
  0x9f   :  { %v80_v36 = vadd.f32 %v79_v32, %v78_v29  ;;  %v77_v37 = vadd.f32 %v76_v35, %v75_v34 }
  0xa0   :  { %v83_v38 = vsel %vm57_vm1, %v74_v33, 0.0 }
  0xa1   :  { %81 = vadd.xlane.f32.xlu0 %v80_v36  ;;  %v84_v39 = vsel %vm57_vm1, %v77_v37, 0.0 }
  0xa2   :  { %v85_v40 = vadd.f32 %v84_v39, %v83_v38 }
  0xa4   :  { %86 = vadd.xlane.f32.xlu1 %v85_v40 }
 0x12e   :  { %v82_v41 = vpop.xlane.xlu0 %81 }
 0x12f   :  { %v95_v43 = vrot.slane %v82_v41, %v94_v6 }
 0x131   :  { %v97_v44 = vadd.f32 %v95_v43, %v88_v42  ;;  %v87_v45 = vpop.xlane.xlu1 %86 }
 0x132   :  { %v105_v47 = vrot.slane %v87_v45, %v94_v6 }
 0x133   :  { %99 = vst.msk [vmem:[#allocation5] sm:$0x1] %vm98_vm2, %v97_v44 }
 0x134   :  { %v107_v48 = vadd.f32 %v105_v47, %v100_v46 }
 0x136   :  { %108 = vst.msk [vmem:[#allocation5 + $0x1] sm:$0x1] %vm98_vm2, %v107_v48 }
 0x137   :  { %165 = shalt.err (!%p162_p12)
}
 0x138   :  { %s166_s28 = scalar_lea.hbm %s243_s2, 32 }
 0x139   :  { %p167_p13 = scmp.ne.s32.totalorder %s243_s2, %s166_s28  ;;  %p170_p0 = scmp.lt.u32.totalorder %s166_s28, %s243_s2 }
 0x13b   :  { %p172_p1 = pnand %p170_p0, %p167_p13 }
 0x13d   :  { %175 = shalt.err (!%p172_p1)
}
 0x13e   :  { %118 = dma.vmem_to_hbm [thread:$0]  %s116_s1, 32, %s243_s2, [#allocation4]  }
 0x13f   :  { %178 = dma.done.wait [#allocation4], 32  }
 0x140   :  { %179 = vsyncadd [#allocation4], 4294967264 }
 0x141   :  { %122 = vsyncpa [#allocation3], 1 }
 0x142   :  { %123 = vsyncpa [#allocation4], 1 }

</bundles_post_ra>
